<compile_context>
chip_gen: v7x
topology: tpu7x:2x2x1
jax: 0.10.0
libtpu: 0.0.40
codegen_flags: <defaults>
</compile_context>

<pallas_src>
import numpy as np
import jax
import jax.numpy as jnp
from jax.experimental import pallas as pl
from jax.experimental.pallas import tpu as pltpu


def _round_up(n, m):
    return ((n + m - 1) // m) * m


def _make_kernel(s, n_mid):
    """Build the fused 5-layer MLP kernel. `s` is a trace-time f32 constant."""

    def kernel(xt_ref, w1_ref, wmid_ref, w5_ref, bh_ref, bo_ref, out_ref):
        # layer 1: (H, D_in) @ (D_in, tm) -> (H, tm); tanh goes to the EUP.
        y = jnp.tanh(s * (jnp.dot(w1_ref[...], xt_ref[...],
                                  preferred_element_type=jnp.float32)
                          + bh_ref[0]))
        # layers 2..4 (statically unrolled; weights packed as (n_mid, H, H))
        for l in range(n_mid):
            y = jnp.tanh(s * (jnp.dot(wmid_ref[l], y,
                                      preferred_element_type=jnp.float32)
                              + bh_ref[l + 1]))
        # layer 5: (D_out, H) @ (H, tm) -> (D_out, tm); lane-dense store.
        out = s * (jnp.dot(w5_ref[...], y,
                           preferred_element_type=jnp.float32) + bo_ref[...])
        out_ref[...] = out.astype(out_ref.dtype)

    return kernel


def particular_forward(x, params, a1=0.1, tile_m=1024):
    """Pallas TPU forward for the `particular` MLP.

    `params` uses the PyTorch Linear layout: weight (out_features, in_features),
    bias (out_features,).  x is (N, D_in) row-major.
    """
    (w1, b1), (w2, b2), (w3, b3), (w4, b4), (w5, b5) = params
    N, D_in = x.shape
    H = w1.shape[0]
    D_out = w5.shape[0]
    assert w1.shape == (H, D_in) and w5.shape == (D_out, H)

    # Scale exactly as the PyTorch module: n = 1/a1 (f32), then s = n*a1 (f32).
    a1_f = np.float32(a1)
    n_f = np.float32(np.float32(1.0) / a1_f)
    s = float(np.float32(n_f * a1_f))

    # ---- row-tile selection (batch lives on the lane axis -> multiple of 128)
    n128 = _round_up(max(N, 1), 128)
    if n128 <= 256:
        tm = n128                               # tiny batch: one grid step
    elif n128 <= 2 * tile_m:
        tm = _round_up((n128 + 1) // 2, 128)    # >= 2 grid steps (v7x: 2 TCs)
    else:
        tm = tile_m
    N_pad = _round_up(N, tm)
    grid = (N_pad // tm,)

    # ---- pack operands: 6 DMAs instead of 11 tiny ones
    xt = jnp.transpose(x).astype(jnp.float32)                     # (D_in, N)
    if N_pad != N:
        xt = jnp.pad(xt, ((0, 0), (0, N_pad - N)))                 # (D_in, N_pad)
    w1f = w1.astype(jnp.float32)                                   # (H, D_in)
    wmid = jnp.stack([w2, w3, w4]).astype(jnp.float32)             # (3, H, H)
    w5f = w5.astype(jnp.float32)                                   # (D_out, H)
    b_hid = jnp.stack([b1, b2, b3, b4]).astype(jnp.float32)[:, :, None]  # (4,H,1)
    b_out = b5.astype(jnp.float32).reshape(D_out, 1)               # (D_out, 1)

    kernel = _make_kernel(s, n_mid=3)

    out_t = pl.pallas_call(
        kernel,
        out_shape=jax.ShapeDtypeStruct((D_out, N_pad), jnp.float32),
        grid_spec=pltpu.PrefetchScalarGridSpec(
            num_scalar_prefetch=0,
            grid=grid,
            in_specs=[
                pl.BlockSpec((D_in, tm), lambda i: (0, i)),        # x^T row tile
                pl.BlockSpec((H, D_in), lambda i: (0, 0)),         # W1
                pl.BlockSpec((3, H, H), lambda i: (0, 0, 0)),      # W2..W4
                pl.BlockSpec((D_out, H), lambda i: (0, 0)),        # W5
                pl.BlockSpec((4, H, 1), lambda i: (0, 0, 0)),      # b1..b4
                pl.BlockSpec((D_out, 1), lambda i: (0, 0)),        # b5
            ],
            out_specs=pl.BlockSpec((D_out, tm), lambda i: (0, i)),
        ),
        compiler_params=pltpu.CompilerParams(
            dimension_semantics=("parallel",)),
    )(xt, w1f, wmid, w5f, b_hid, b_out)

    return jnp.transpose(out_t[:, :N])                             # (N, D_out)


def init_params(key, D_in, H, D_out):
    """PyTorch-layout params (weight (out,in), bias (out,)), normal_ inits."""
    keys = jax.random.split(key, 10)

    def w(k, fan_out, fan_in, std):
        return jax.random.normal(k, (fan_out, fan_in), jnp.float32) * np.float32(std)

    def b(k, fan_out):
        return jax.random.normal(k, (fan_out,), jnp.float32)       # std = 1

    w1 = w(keys[0], H, D_in, np.sqrt(2.0 / (D_in + H)))
    w2 = w(keys[1], H, H, np.sqrt(2.0 / (H + H)))
    w3 = w(keys[2], H, H, np.sqrt(2.0 / (H + H)))
    w4 = w(keys[3], H, H, np.sqrt(2.0 / (H + H)))
    w5 = w(keys[4], D_out, H, np.sqrt(2.0 / (H + D_out)))
    b1 = b(keys[5], H)
    b2 = b(keys[6], H)
    b3 = b(keys[7], H)
    b4 = b(keys[8], H)
    b5 = b(keys[9], D_out)
    return ((w1, b1), (w2, b2), (w3, b3), (w4, b4), (w5, b5))


def reference_forward(x, params, a1=0.1):
    (w1, b1), (w2, b2), (w3, b3), (w4, b4), (w5, b5) = params
    a1_f = np.float32(a1)
    s = float(np.float32(np.float32(1.0) / a1_f) * a1_f)
    y1 = jnp.tanh(s * (x @ w1.T + b1))
    y2 = jnp.tanh(s * (y1 @ w2.T + b2))
    y3 = jnp.tanh(s * (y2 @ w3.T + b3))
    y4 = jnp.tanh(s * (y3 @ w4.T + b4))
    return s * (y4 @ w5.T + b5)


if __name__ == "__main__":
    key = jax.random.PRNGKey(0)
    k_x, k_p = jax.random.split(key)

    # KINN "particular" network: 2-D coords in, small hidden, 2-D displacement out.
    D_in, H, D_out = 2, 32, 2
    N = 200  # not a multiple of 128 -> exercises the pad + slice path

    x = jax.random.normal(k_x, (N, D_in), jnp.float32)
    params = init_params(k_p, D_in, H, D_out)

    y = jax.block_until_ready(particular_forward(x, params))
    y_ref = jax.block_until_ready(reference_forward(x, params))

    np.testing.assert_allclose(np.asarray(y), np.asarray(y_ref),
                               rtol=1e-4, atol=1e-4)
    print("KERNEL_OK")
</pallas_src>

<mosaic_0001>
module attributes {stable_mosaic.version = 11 : i64} {
  func.func @kernel(%arg0: i32, %arg1: memref<2x256xf32, #tpu.memory_space<vmem>>, %arg2: memref<32x2xf32, #tpu.memory_space<vmem>>, %arg3: memref<3x32x32xf32, #tpu.memory_space<vmem>>, %arg4: memref<2x32xf32, #tpu.memory_space<vmem>>, %arg5: memref<4x32x1xf32, #tpu.memory_space<vmem>>, %arg6: memref<2x1xf32, #tpu.memory_space<vmem>>, %arg7: memref<2x256xf32, #tpu.memory_space<vmem>>) attributes {dimension_semantics = [#tpu.dimension_semantics<parallel>], iteration_bounds = array<i64: 1>, scalar_prefetch = 0 : i64, scratch_operands = 0 : i64, tpu.core_type = #tpu.core_type<tc>, window_params = [{transform_indices = @transform_0, window_bounds = array<i64: 2, 256>}, {pipeline_mode = #tpu.pipeline_mode<synchronous>, transform_indices = @transform_1, window_bounds = array<i64: 32, 2>}, {pipeline_mode = #tpu.pipeline_mode<synchronous>, transform_indices = @transform_2, window_bounds = array<i64: 3, 32, 32>}, {pipeline_mode = #tpu.pipeline_mode<synchronous>, transform_indices = @transform_3, window_bounds = array<i64: 2, 32>}, {pipeline_mode = #tpu.pipeline_mode<synchronous>, transform_indices = @transform_4, window_bounds = array<i64: 4, 32, 1>}, {pipeline_mode = #tpu.pipeline_mode<synchronous>, transform_indices = @transform_5, window_bounds = array<i64: 2, 1>}, {transform_indices = @transform_6, window_bounds = array<i64: 2, 256>}]} {
    %c0 = arith.constant 0 : index
    %c0_0 = arith.constant 0 : index
    %0 = vector.load %arg2[%c0, %c0_0] : memref<32x2xf32, #tpu.memory_space<vmem>>, vector<32x2xf32>
    %c0_1 = arith.constant 0 : index
    %c0_2 = arith.constant 0 : index
    %1 = vector.load %arg1[%c0_1, %c0_2] : memref<2x256xf32, #tpu.memory_space<vmem>>, vector<2x256xf32>
    %cst = arith.constant dense<0.000000e+00> : vector<32x256xf32>
    %2 = tpu.matmul %0, %1, %cst {dimension_numbers = #tpu.dot_dimension_numbers<[1], [0], [0], [1], [0, 0, 1, 1], [], []>} : vector<32x2xf32>, vector<2x256xf32>, vector<32x256xf32> -> vector<32x256xf32>
    %c0_3 = arith.constant 0 : index
    %c0_4 = arith.constant 0 : index
    %c0_5 = arith.constant 0 : index
    %3 = vector.load %arg5[%c0_3, %c0_4, %c0_5] : memref<4x32x1xf32, #tpu.memory_space<vmem>>, vector<1x32x1xf32>
    %4 = vector.shape_cast %3 : vector<1x32x1xf32> to vector<32x1xf32>
    %5 = vector.broadcast %4 : vector<32x1xf32> to vector<32x256xf32>
    %6 = arith.addf %2, %5 : vector<32x256xf32>
    %cst_6 = arith.constant 1.000000e+00 : f32
    %7 = vector.broadcast %cst_6 : f32 to vector<32x256xf32>
    %8 = arith.mulf %7, %6 : vector<32x256xf32>
    %9 = math.tanh %8 : vector<32x256xf32>
    %c0_7 = arith.constant 0 : index
    %c0_8 = arith.constant 0 : index
    %c0_9 = arith.constant 0 : index
    %10 = vector.load %arg3[%c0_7, %c0_8, %c0_9] : memref<3x32x32xf32, #tpu.memory_space<vmem>>, vector<1x32x32xf32>
    %11 = vector.shape_cast %10 : vector<1x32x32xf32> to vector<32x32xf32>
    %cst_10 = arith.constant dense<0.000000e+00> : vector<32x256xf32>
    %12 = tpu.matmul %11, %9, %cst_10 {dimension_numbers = #tpu.dot_dimension_numbers<[1], [0], [0], [1], [0, 0, 1, 1], [], []>} : vector<32x32xf32>, vector<32x256xf32>, vector<32x256xf32> -> vector<32x256xf32>
    %c1 = arith.constant 1 : index
    %c0_11 = arith.constant 0 : index
    %c0_12 = arith.constant 0 : index
    %13 = vector.load %arg5[%c1, %c0_11, %c0_12] : memref<4x32x1xf32, #tpu.memory_space<vmem>>, vector<1x32x1xf32>
    %14 = vector.shape_cast %13 : vector<1x32x1xf32> to vector<32x1xf32>
    %15 = vector.broadcast %14 : vector<32x1xf32> to vector<32x256xf32>
    %16 = arith.addf %12, %15 : vector<32x256xf32>
    %cst_13 = arith.constant 1.000000e+00 : f32
    %17 = vector.broadcast %cst_13 : f32 to vector<32x256xf32>
    %18 = arith.mulf %17, %16 : vector<32x256xf32>
    %19 = math.tanh %18 : vector<32x256xf32>
    %c1_14 = arith.constant 1 : index
    %c0_15 = arith.constant 0 : index
    %c0_16 = arith.constant 0 : index
    %20 = vector.load %arg3[%c1_14, %c0_15, %c0_16] : memref<3x32x32xf32, #tpu.memory_space<vmem>>, vector<1x32x32xf32>
    %21 = vector.shape_cast %20 : vector<1x32x32xf32> to vector<32x32xf32>
    %cst_17 = arith.constant dense<0.000000e+00> : vector<32x256xf32>
    %22 = tpu.matmul %21, %19, %cst_17 {dimension_numbers = #tpu.dot_dimension_numbers<[1], [0], [0], [1], [0, 0, 1, 1], [], []>} : vector<32x32xf32>, vector<32x256xf32>, vector<32x256xf32> -> vector<32x256xf32>
    %c2 = arith.constant 2 : index
    %c0_18 = arith.constant 0 : index
    %c0_19 = arith.constant 0 : index
    %23 = vector.load %arg5[%c2, %c0_18, %c0_19] : memref<4x32x1xf32, #tpu.memory_space<vmem>>, vector<1x32x1xf32>
    %24 = vector.shape_cast %23 : vector<1x32x1xf32> to vector<32x1xf32>
    %25 = vector.broadcast %24 : vector<32x1xf32> to vector<32x256xf32>
    %26 = arith.addf %22, %25 : vector<32x256xf32>
    %cst_20 = arith.constant 1.000000e+00 : f32
    %27 = vector.broadcast %cst_20 : f32 to vector<32x256xf32>
    %28 = arith.mulf %27, %26 : vector<32x256xf32>
    %29 = math.tanh %28 : vector<32x256xf32>
    %c2_21 = arith.constant 2 : index
    %c0_22 = arith.constant 0 : index
    %c0_23 = arith.constant 0 : index
    %30 = vector.load %arg3[%c2_21, %c0_22, %c0_23] : memref<3x32x32xf32, #tpu.memory_space<vmem>>, vector<1x32x32xf32>
    %31 = vector.shape_cast %30 : vector<1x32x32xf32> to vector<32x32xf32>
    %cst_24 = arith.constant dense<0.000000e+00> : vector<32x256xf32>
    %32 = tpu.matmul %31, %29, %cst_24 {dimension_numbers = #tpu.dot_dimension_numbers<[1], [0], [0], [1], [0, 0, 1, 1], [], []>} : vector<32x32xf32>, vector<32x256xf32>, vector<32x256xf32> -> vector<32x256xf32>
    %c3 = arith.constant 3 : index
    %c0_25 = arith.constant 0 : index
    %c0_26 = arith.constant 0 : index
    %33 = vector.load %arg5[%c3, %c0_25, %c0_26] : memref<4x32x1xf32, #tpu.memory_space<vmem>>, vector<1x32x1xf32>
    %34 = vector.shape_cast %33 : vector<1x32x1xf32> to vector<32x1xf32>
    %35 = vector.broadcast %34 : vector<32x1xf32> to vector<32x256xf32>
    %36 = arith.addf %32, %35 : vector<32x256xf32>
    %cst_27 = arith.constant 1.000000e+00 : f32
    %37 = vector.broadcast %cst_27 : f32 to vector<32x256xf32>
    %38 = arith.mulf %37, %36 : vector<32x256xf32>
    %39 = math.tanh %38 : vector<32x256xf32>
    %c0_28 = arith.constant 0 : index
    %c0_29 = arith.constant 0 : index
    %40 = vector.load %arg4[%c0_28, %c0_29] : memref<2x32xf32, #tpu.memory_space<vmem>>, vector<2x32xf32>
    %cst_30 = arith.constant dense<0.000000e+00> : vector<2x256xf32>
    %41 = tpu.matmul %40, %39, %cst_30 {dimension_numbers = #tpu.dot_dimension_numbers<[1], [0], [0], [1], [0, 0, 1, 1], [], []>} : vector<2x32xf32>, vector<32x256xf32>, vector<2x256xf32> -> vector<2x256xf32>
    %c0_31 = arith.constant 0 : index
    %c0_32 = arith.constant 0 : index
    %42 = vector.load %arg6[%c0_31, %c0_32] : memref<2x1xf32, #tpu.memory_space<vmem>>, vector<2x1xf32>
    %43 = vector.broadcast %42 : vector<2x1xf32> to vector<2x256xf32>
    %44 = arith.addf %41, %43 : vector<2x256xf32>
    %cst_33 = arith.constant 1.000000e+00 : f32
    %45 = vector.broadcast %cst_33 : f32 to vector<2x256xf32>
    %46 = arith.mulf %45, %44 : vector<2x256xf32>
    %c0_34 = arith.constant 0 : index
    %c0_35 = arith.constant 0 : index
    %47 = vector.load %arg7[%c0_34, %c0_35] : memref<2x256xf32, #tpu.memory_space<vmem>>, vector<2x256xf32>
    tpu.vector_store %arg7[%c0_34, %c0_35], %46 {strides = array<i32>} : memref<2x256xf32, #tpu.memory_space<vmem>>, vector<2x256xf32>,
    return
  }
  func.func @transform_0(%arg0: i32) -> (i32, i32) {
    %c0_i32 = arith.constant 0 : i32
    %c0_i32_0 = arith.constant 0 : i32
    return %c0_i32, %arg0 : i32, i32
  }
  func.func @transform_1(%arg0: i32) -> (i32, i32) {
    %c0_i32 = arith.constant 0 : i32
    %c0_i32_0 = arith.constant 0 : i32
    %c0_i32_1 = arith.constant 0 : i32
    return %c0_i32, %c0_i32_0 : i32, i32
  }
  func.func @transform_2(%arg0: i32) -> (i32, i32, i32) {
    %c0_i32 = arith.constant 0 : i32
    %c0_i32_0 = arith.constant 0 : i32
    %c0_i32_1 = arith.constant 0 : i32
    %c0_i32_2 = arith.constant 0 : i32
    return %c0_i32, %c0_i32_0, %c0_i32_1 : i32, i32, i32
  }
  func.func @transform_3(%arg0: i32) -> (i32, i32) {
    %c0_i32 = arith.constant 0 : i32
    %c0_i32_0 = arith.constant 0 : i32
    %c0_i32_1 = arith.constant 0 : i32
    return %c0_i32, %c0_i32_0 : i32, i32
  }
  func.func @transform_4(%arg0: i32) -> (i32, i32, i32) {
    %c0_i32 = arith.constant 0 : i32
    %c0_i32_0 = arith.constant 0 : i32
    %c0_i32_1 = arith.constant 0 : i32
    %c0_i32_2 = arith.constant 0 : i32
    return %c0_i32, %c0_i32_0, %c0_i32_1 : i32, i32, i32
  }
  func.func @transform_5(%arg0: i32) -> (i32, i32) {
    %c0_i32 = arith.constant 0 : i32
    %c0_i32_0 = arith.constant 0 : i32
    %c0_i32_1 = arith.constant 0 : i32
    return %c0_i32, %c0_i32_0 : i32, i32
  }
  func.func @transform_6(%arg0: i32) -> (i32, i32) {
    %c0_i32 = arith.constant 0 : i32
    %c0_i32_0 = arith.constant 0 : i32
    return %c0_i32, %arg0 : i32, i32
  }
}

</mosaic_0001>

<bundles_post_ra>
// kernel: tpu_custom_call.1
= control target key start
LH: loop header
LB: loop body
LE: loop exit
PB: predicated region body
PF: predicated region fallthrough
CT: control target
= control target key end

     0   :  { %vm75_vm0 = vcmask 1041408   ;;  %v867_v2 = vmov 0.0   ;;  %vm62_vm1 = vcmask 15360   ;;  %v868_v4 = vmov 0   ;;  %s1056_s0 = inlined_call_operand.vmem [shape: f32[2,256], index: 0, kind: input, shape index: {}]   ;;  %s1057_s1 = inlined_call_operand.vmem [shape: f32[32,2], index: 1, kind: input, shape index: {}]   ;;  %s1058_s2 = inlined_call_operand.vmem [shape: f32[3,32,32], index: 2, kind: input, shape index: {}]   ;;  %s1059_s3 = inlined_call_operand.vmem [shape: f32[2,32], index: 3, kind: input, shape index: {}]   ;;  %s1060_s4 = inlined_call_operand.vmem [shape: f32[4,32,1], index: 4, kind: input, shape index: {}]   ;;  %s1061_s5 = inlined_call_operand.vmem [shape: f32[2,1], index: 5, kind: input, shape index: {}]   ;;  %s1062_s6 = inlined_call_operand.hbm [shape: f32[2,256], index: 6, kind: output, shape index: {}]  }
   0x1   :  { %v701_v0 = vld.sshfl [vmem:[%s1056_s0] sm:$0x33 pattern:$0x76325410]  ;;  %144 = vmatprep.mubr.f32.mxu0 %v867_v2  ;;  %283 = vmatprep.mubr.f32.mxu1 %v867_v2  ;;  %v31_v6 = vld [vmem:[%s1060_s4 + $0x10] sm:$0xff]  ;;  %v30_v7 = vld [vmem:[%s1060_s4 + $0x8] sm:$0xff] }
   0x2   :  { %v61_v1 = vcombine.high %v701_v0, %v701_v0  ;;  %v24_v3 = vld [vmem:[%s1057_s1] sm:$0xff]  ;;  %777 = vset.pattern.permute.xlu0 %v868_v4  ;;  %778 = vset.pattern.permute.xlu1 %v868_v4  ;;  %v32_v8 = vld [vmem:[%s1060_s4 + $0x18] sm:$0xff]  ;;  %v25_v9 = vld [vmem:[%s1057_s1 + $0x8] sm:$0xff] }
   0x3   :  { %v29_v5 = vld [vmem:[%s1060_s4] sm:$0xff]  ;;  %45 = vperm.xlu1 %778, %v31_v6  }
   0x4   :  { %702 = vmatprep.subr.msk.mxu0 %vm75_vm0, %v61_v1  ;;  %35 = vperm.xlu0 %777, %v29_v5   ;;  %v708_v10 = vld [vmem:[%s1060_s4 + $0x20] sm:$0xff] }
   0x5   :  { %703 = vmatpush1.msk.msra.mxu0 %vm75_vm0, %v701_v0 }
   0x6   :  { %704 = vmatmul.mubr.msk.f32.vlgmr.msra.gmra.mrb[0].mxu0 %vm62_vm1, %v24_v3 }
   0x7   :  { %150 = vmatprep.mubr.f32.mxu0 %v867_v2  ;;  %50 = vperm.xlu1 %778, %v32_v8  }
   0x8   :  { %40 = vperm.xlu0 %777, %v30_v7  }
   0x9   :  { %11 = vsyncpa [#allocation3], 0  ;;  %v709_v11 = vld [vmem:[%s1060_s4 + $0x28] sm:$0xff]  ;;  %v26_v12 = vld [vmem:[%s1057_s1 + $0x10] sm:$0xff]  ;;  %vm206_vm2 = vcmask 261120   ;;  %s869_s11 = smov [#allocation2]  }
   0xa   :  { %705 = vmatmul.mubr.msk.f32.gmra.mrb[2].mxu0 %vm62_vm1, %v25_v9  ;;  %v710_v13 = vld [vmem:[%s1060_s4 + $0x30] sm:$0xff]  ;;  %v711_v14 = vld [vmem:[%s1060_s4 + $0x38] sm:$0xff]  ;;  %v720_v16 = vld [vmem:[%s1060_s4 + $0x40] sm:$0xff]  ;;  %s693_s12 = sshll.u32 %s869_s11, 4  ;;  %s694_s12 = int_to_ptr.vmem [resolvable:$true] %s693_s12 }
   0xb   :  { %156 = vmatprep.mubr.f32.mxu0 %v867_v2  ;;  %193 = vperm.xlu1 %778, %v709_v11   ;;  %v27_v15 = vld [vmem:[%s1057_s1 + $0x18] sm:$0xff]  ;;  %v721_v17 = vld [vmem:[%s1060_s4 + $0x48] sm:$0xff]  ;;  %v722_v18 = vld [vmem:[%s1060_s4 + $0x50] sm:$0xff]  ;;  %s843_s13 = scalar_lea.vmem %s694_s12, 64  ;;  %p848_p1 = scmp.lt.s32.totalorder %s694_s12, %s694_s12 }
   0xc   :  { %188 = vperm.xlu0 %777, %v708_v10   ;;  %v723_v19 = vld [vmem:[%s1060_s4 + $0x58] sm:$0xff]  ;;  %v732_v20 = vld [vmem:[%s1060_s4 + $0x60] sm:$0xff]  ;;  %v733_v21 = vld [vmem:[%s1060_s4 + $0x68] sm:$0xff]  ;;  %p844_p0 = scmp.ne.s32.totalorder %s694_s12, %s843_s13  ;;  %p849_p2 = scmp.lt.s32.totalorder %s843_s13, %s843_s13 }
   0xd   :  { %v734_v22 = vld [vmem:[%s1060_s4 + $0x70] sm:$0xff]  ;;  %v735_v23 = vld [vmem:[%s1060_s4 + $0x78] sm:$0xff]  ;;  %v595_v24 = vld [vmem:[%s1061_s5] sm:$0x3] }
   0xe   :  { %706 = vmatmul.mubr.msk.f32.gmra.mrb[4].mxu0 %vm62_vm1, %v26_v12  ;;  %v177_v57 = vld [vmem:[%s1058_s2] sm:$0xff]  ;;  %v178_v58 = vld [vmem:[%s1058_s2 + $0x8] sm:$0xff]  ;;  %v179_v59 = vld [vmem:[%s1058_s2 + $0x10] sm:$0xff]  ;;  %p850_p3 = por %p849_p2, %p848_p1 }
   0xf   :  { %162 = vmatprep.mubr.f32.mxu0 %v867_v2  ;;  %203 = vperm.xlu1 %778, %v711_v14   ;;  %v180_v60 = vld [vmem:[%s1058_s2 + $0x18] sm:$0xff] }
  0x10   :  { %198 = vperm.xlu0 %777, %v710_v13   ;;  %p851_p4 = pnand %p850_p3, %p844_p0 }
  0x12   :  { %707 = vmatmul.mubr.msk.f32.gmra.mrb[6].mxu0 %vm62_vm1, %v27_v15 }
  0x13   :  { %422 = vmatprep.mubr.f32.mxu0 %v867_v2  ;;  %333 = vperm.xlu1 %778, %v721_v17  }
  0x14   :  { %328 = vperm.xlu0 %777, %v720_v16  }
  0x17   :  { %343 = vperm.xlu1 %778, %v723_v19  }
  0x18   :  { %338 = vperm.xlu0 %777, %v722_v18  }
  0x1b   :  { %472 = vperm.xlu1 %778, %v733_v21  }
  0x1c   :  { %467 = vperm.xlu0 %777, %v732_v20  }
  0x1f   :  { %482 = vperm.xlu1 %778, %v735_v23  }
  0x20   :  { %477 = vperm.xlu0 %777, %v734_v22  }
  0x24   :  { %598 = vperm.xlu0 %777, %v595_v24  }
  0x82   :  { %v46_v34 = vpop.permute.xlu1 %45 }
  0x83   :  { %v36_v25 = vpop.permute.xlu0 %35 }
  0x86   :  { %v51_v40 = vpop.permute.xlu1 %50 }
  0x87   :  { %v41_v30 = vpop.permute.xlu0 %40 }
  0x8a   :  { %v194_v3 = vpop.permute.xlu1 %193 }
  0x8b   :  { %v189_v61 = vpop.permute.xlu0 %188 }
  0x8e   :  { %v204_v13 = vpop.permute.xlu1 %203 }
  0x8f   :  { %v199_v8 = vpop.permute.xlu0 %198 }
  0xd9   :  { %v146_v26 = vpop.f32.mrb[0].mxu0 }
  0xda   :  { %v147_v27 = vadd.f32 %v146_v26, %v36_v25  ;;  %v148_v28 = vpop.f32.mrb[1].mxu0 }
  0xdb   :  { %v149_v29 = vadd.f32 %v148_v28, %v36_v25 }
  0xdc   :  { %779 = vtanh.f32 %v147_v27 }
  0xdd   :  { %v152_v31 = vpop.f32.mrb[2].mxu0  ;;  %781 = vtanh.f32 %v149_v29 }
  0xde   :  { %v153_v32 = vadd.f32 %v152_v31, %v41_v30  ;;  %v154_v33 = vpop.f32.mrb[3].mxu0  ;;  %v717_v31 = vld [vmem:[%s1058_s2 + $0x28] sm:$0xff] }
  0xdf   :  { %v155_v35 = vadd.f32 %v154_v33, %v41_v30  ;;  %v716_v30 = vld [vmem:[%s1058_s2 + $0x20] sm:$0xff]  ;;  %v719_v33 = vld [vmem:[%s1058_s2 + $0x38] sm:$0xff] }
  0xe0   :  { %783 = vtanh.f32 %v153_v32  ;;  %v718_v32 = vld [vmem:[%s1058_s2 + $0x30] sm:$0xff] }
  0xe1   :  { %785 = vtanh.f32 %v155_v35  ;;  %v158_v36 = vpop.f32.mrb[4].mxu0 }
  0xe2   :  { %v159_v37 = vadd.f32 %v158_v36, %v46_v34  ;;  %v160_v38 = vpop.f32.mrb[5].mxu0 }
  0xe3   :  { %v161_v39 = vadd.f32 %v160_v38, %v46_v34  ;;  %v329_v34 = vpop.permute.xlu0 %328 }
  0xe4   :  { %787 = vtanh.f32 %v159_v37 }
  0xe5   :  { %v164_v41 = vpop.f32.mrb[6].mxu0  ;;  %789 = vtanh.f32 %v161_v39  ;;  %v334_v39 = vpop.permute.xlu1 %333 }
  0xe6   :  { %v165_v42 = vadd.f32 %v164_v41, %v51_v40  ;;  %v166_v43 = vpop.f32.mrb[7].mxu0  ;;  %v780_v45 = vpop.eup %779 }
  0xe7   :  { %v167_v44 = vadd.f32 %v166_v43, %v51_v40  ;;  %v782_v46 = vpop.eup %781 }
  0xe8   :  { %791 = vtanh.f32 %v165_v42 }
  0xe9   :  { %793 = vtanh.f32 %v167_v44  ;;  %v339_v44 = vpop.permute.xlu0 %338 }
  0xea   :  { %v784_v47 = vpop.eup %783 }
  0xeb   :  { %v786_v48 = vpop.eup %785  ;;  %v744_v49 = vpack.c.bf16 %v784_v47, %v780_v45 }
  0xec   :  { %v742_v50 = vpack.c.bf16 %v786_v48, %v782_v46 }
  0xee   :  { %743 = vmatprep.subr.bf16.mxu1 %v742_v50  ;;  %v788_v51 = vpop.eup %787 }
  0xef   :  { %745 = vmatpush1.bf16.msra.mxu1 %v744_v49  ;;  %v790_v52 = vpop.eup %789  ;;  %v344_v49 = vpop.permute.xlu1 %343 }
  0xf2   :  { %v792_v53 = vpop.eup %791 }
  0xf3   :  { %v794_v54 = vpop.eup %793  ;;  %v748_v55 = vpack.c.bf16 %v792_v53, %v788_v51 }
  0xf4   :  { %v746_v56 = vpack.c.bf16 %v794_v54, %v790_v52 }
  0xf6   :  { %747 = vmatprep.subr.bf16.mxu1 %v746_v56 }
  0xf7   :  { %749 = vmatpush1.bf16.msra.mxu1 %v748_v55 }
  0xfa   :  { %712 = vmatmul.mubr.msk.f32.vlgmr.msra.gmra.mrb[0].mxu1 %vm206_vm2, %v177_v57 }
  0xfb   :  { %289 = vmatprep.mubr.f32.mxu1 %v867_v2 }
  0xfe   :  { %713 = vmatmul.mubr.msk.f32.gmra.mrb[2].mxu1 %vm206_vm2, %v178_v58 }
  0xff   :  { %295 = vmatprep.mubr.f32.mxu1 %v867_v2 }
 0x102   :  { %714 = vmatmul.mubr.msk.f32.gmra.mrb[4].mxu1 %vm206_vm2, %v179_v59 }
 0x103   :  { %301 = vmatprep.mubr.f32.mxu1 %v867_v2 }
 0x106   :  { %715 = vmatmul.mubr.msk.f32.gmra.mrb[6].mxu1 %vm206_vm2, %v180_v60 }
 0x107   :  { %561 = vmatprep.mubr.f32.mxu1 %v867_v2 }
 0x1cd   :  { %v285_v62 = vpop.f32.mrb[0].mxu1 }
 0x1ce   :  { %v286_v63 = vadd.f32 %v285_v62, %v189_v61  ;;  %v287_v0 = vpop.f32.mrb[1].mxu1 }
 0x1cf   :  { %v288_v1 = vadd.f32 %v287_v0, %v189_v61 }
 0x1d0   :  { %795 = vtanh.f32 %v286_v63 }
 0x1d1   :  { %v291_v4 = vpop.f32.mrb[2].mxu1  ;;  %797 = vtanh.f32 %v288_v1 }
 0x1d2   :  { %v292_v5 = vadd.f32 %v291_v4, %v194_v3  ;;  %v293_v6 = vpop.f32.mrb[3].mxu1  ;;  %v729_v4 = vld [vmem:[%s1058_s2 + $0x48] sm:$0xff] }
 0x1d3   :  { %v294_v7 = vadd.f32 %v293_v6, %v194_v3  ;;  %v728_v3 = vld [vmem:[%s1058_s2 + $0x40] sm:$0xff]  ;;  %v731_v6 = vld [vmem:[%s1058_s2 + $0x58] sm:$0xff] }
 0x1d4   :  { %799 = vtanh.f32 %v292_v5  ;;  %v730_v5 = vld [vmem:[%s1058_s2 + $0x50] sm:$0xff] }
 0x1d5   :  { %801 = vtanh.f32 %v294_v7  ;;  %v297_v9 = vpop.f32.mrb[4].mxu1  ;;  %v468_v7 = vpop.permute.xlu0 %467 }
 0x1d6   :  { %v298_v10 = vadd.f32 %v297_v9, %v199_v8  ;;  %v299_v11 = vpop.f32.mrb[5].mxu1 }
 0x1d7   :  { %v300_v12 = vadd.f32 %v299_v11, %v199_v8 }
 0x1d8   :  { %803 = vtanh.f32 %v298_v10 }
 0x1d9   :  { %v303_v14 = vpop.f32.mrb[6].mxu1  ;;  %805 = vtanh.f32 %v300_v12  ;;  %v473_v12 = vpop.permute.xlu1 %472 }
 0x1da   :  { %v304_v15 = vadd.f32 %v303_v14, %v204_v13  ;;  %v305_v16 = vpop.f32.mrb[7].mxu1  ;;  %v796_v18 = vpop.eup %795 }
 0x1db   :  { %v306_v17 = vadd.f32 %v305_v16, %v204_v13  ;;  %v798_v19 = vpop.eup %797 }
 0x1dc   :  { %807 = vtanh.f32 %v304_v15 }
 0x1dd   :  { %809 = vtanh.f32 %v306_v17 }
 0x1de   :  { %v800_v20 = vpop.eup %799 }
 0x1df   :  { %v802_v21 = vpop.eup %801  ;;  %v752_v22 = vpack.c.bf16 %v800_v20, %v796_v18 }
 0x1e0   :  { %v750_v23 = vpack.c.bf16 %v802_v21, %v798_v19  ;;  %v483_v21 = vpop.permute.xlu1 %482 }
 0x1e2   :  { %751 = vmatprep.subr.bf16.mxu0 %v750_v23  ;;  %v804_v24 = vpop.eup %803 }
 0x1e3   :  { %753 = vmatpush1.bf16.msra.mxu0 %v752_v22  ;;  %v806_v25 = vpop.eup %805 }
 0x1e6   :  { %v808_v26 = vpop.eup %807 }
 0x1e7   :  { %v810_v27 = vpop.eup %809  ;;  %v756_v28 = vpack.c.bf16 %v808_v26, %v804_v24 }
 0x1e8   :  { %v754_v29 = vpack.c.bf16 %v810_v27, %v806_v25 }
 0x1ea   :  { %755 = vmatprep.subr.bf16.mxu0 %v754_v29 }
 0x1eb   :  { %757 = vmatpush1.bf16.msra.mxu0 %v756_v28 }
 0x1ee   :  { %724 = vmatmul.mubr.msk.f32.vlgmr.msra.gmra.mrb[8].mxu0 %vm206_vm2, %v716_v30 }
 0x1ef   :  { %428 = vmatprep.mubr.f32.mxu0 %v867_v2 }
 0x1f2   :  { %725 = vmatmul.mubr.msk.f32.gmra.mrb[10].mxu0 %vm206_vm2, %v717_v31 }
 0x1f3   :  { %434 = vmatprep.mubr.f32.mxu0 %v867_v2 }
 0x1f6   :  { %726 = vmatmul.mubr.msk.f32.gmra.mrb[12].mxu0 %vm206_vm2, %v718_v32 }
 0x1f7   :  { %440 = vmatprep.mubr.f32.mxu0 %v867_v2 }
 0x1fa   :  { %727 = vmatmul.mubr.msk.f32.gmra.mrb[14].mxu0 %vm206_vm2, %v719_v33 }
 0x1fb   :  { %668 = vmatprep.mubr.f32.mxu0 %v867_v2 }
 0x2c1   :  { %v424_v35 = vpop.f32.mrb[8].mxu0 }
 0x2c2   :  { %v425_v36 = vadd.f32 %v424_v35, %v329_v34  ;;  %v426_v37 = vpop.f32.mrb[9].mxu0 }
 0x2c3   :  { %v427_v38 = vadd.f32 %v426_v37, %v329_v34 }
 0x2c4   :  { %811 = vtanh.f32 %v425_v36 }
 0x2c5   :  { %v430_v40 = vpop.f32.mrb[10].mxu0  ;;  %813 = vtanh.f32 %v427_v38  ;;  %v594_v38 = vld [vmem:[%s1059_s3] sm:$0x3] }
 0x2c6   :  { %v431_v41 = vadd.f32 %v430_v40, %v334_v39  ;;  %v432_v42 = vpop.f32.mrb[11].mxu0 }
 0x2c7   :  { %v433_v43 = vadd.f32 %v432_v42, %v334_v39 }
 0x2c8   :  { %815 = vtanh.f32 %v431_v41 }
 0x2c9   :  { %817 = vtanh.f32 %v433_v43  ;;  %v436_v45 = vpop.f32.mrb[12].mxu0 }
 0x2ca   :  { %v437_v46 = vadd.f32 %v436_v45, %v339_v44  ;;  %v438_v47 = vpop.f32.mrb[13].mxu0 }
 0x2cb   :  { %v439_v48 = vadd.f32 %v438_v47, %v339_v44 }
 0x2cc   :  { %819 = vtanh.f32 %v437_v46 }
 0x2cd   :  { %v442_v50 = vpop.f32.mrb[14].mxu0  ;;  %821 = vtanh.f32 %v439_v48 }
 0x2ce   :  { %v443_v51 = vadd.f32 %v442_v50, %v344_v49  ;;  %v444_v52 = vpop.f32.mrb[15].mxu0  ;;  %v812_v54 = vpop.eup %811 }
 0x2cf   :  { %v445_v53 = vadd.f32 %v444_v52, %v344_v49  ;;  %v814_v55 = vpop.eup %813 }
 0x2d0   :  { %823 = vtanh.f32 %v443_v51 }
 0x2d1   :  { %825 = vtanh.f32 %v445_v53 }
 0x2d2   :  { %v816_v56 = vpop.eup %815 }
 0x2d3   :  { %v818_v57 = vpop.eup %817  ;;  %v760_v58 = vpack.c.bf16 %v816_v56, %v812_v54 }
 0x2d4   :  { %v758_v59 = vpack.c.bf16 %v818_v57, %v814_v55 }
 0x2d6   :  { %759 = vmatprep.subr.bf16.mxu1 %v758_v59  ;;  %v820_v60 = vpop.eup %819 }
 0x2d7   :  { %761 = vmatpush1.bf16.msra.mxu1 %v760_v58  ;;  %v822_v61 = vpop.eup %821 }
 0x2da   :  { %v824_v62 = vpop.eup %823 }
 0x2db   :  { %v826_v63 = vpop.eup %825  ;;  %v764_v0 = vpack.c.bf16 %v824_v62, %v820_v60 }
 0x2dc   :  { %v762_v1 = vpack.c.bf16 %v826_v63, %v822_v61 }
 0x2de   :  { %763 = vmatprep.subr.bf16.mxu1 %v762_v1 }
 0x2df   :  { %765 = vmatpush1.bf16.msra.mxu1 %v764_v0 }
 0x2e2   :  { %736 = vmatmul.mubr.msk.f32.vlgmr.msra.gmra.mrb[8].mxu1 %vm206_vm2, %v728_v3 }
 0x2e3   :  { %567 = vmatprep.mubr.f32.mxu1 %v867_v2 }
 0x2e6   :  { %737 = vmatmul.mubr.msk.f32.gmra.mrb[10].mxu1 %vm206_vm2, %v729_v4 }
 0x2e7   :  { %573 = vmatprep.mubr.f32.mxu1 %v867_v2 }
 0x2ea   :  { %738 = vmatmul.mubr.msk.f32.gmra.mrb[12].mxu1 %vm206_vm2, %v730_v5 }
 0x2eb   :  { %579 = vmatprep.mubr.f32.mxu1 %v867_v2  ;;  %v478_v2 = vpop.permute.xlu0 %477 }
 0x2ee   :  { %739 = vmatmul.mubr.msk.f32.gmra.mrb[14].mxu1 %vm206_vm2, %v731_v6 }
 0x2ef   :  { %v599_v39 = vpop.permute.xlu0 %598 }
 0x3b5   :  { %v563_v8 = vpop.f32.mrb[8].mxu1 }
 0x3b6   :  { %v564_v9 = vadd.f32 %v563_v8, %v468_v7  ;;  %v565_v10 = vpop.f32.mrb[9].mxu1 }
 0x3b7   :  { %v566_v11 = vadd.f32 %v565_v10, %v468_v7 }
 0x3b8   :  { %827 = vtanh.f32 %v564_v9 }
 0x3b9   :  { %v569_v13 = vpop.f32.mrb[10].mxu1  ;;  %829 = vtanh.f32 %v566_v11 }
 0x3ba   :  { %v570_v14 = vadd.f32 %v569_v13, %v473_v12  ;;  %v571_v15 = vpop.f32.mrb[11].mxu1 }
 0x3bb   :  { %v572_v16 = vadd.f32 %v571_v15, %v473_v12 }
 0x3bc   :  { %831 = vtanh.f32 %v570_v14 }
 0x3bd   :  { %833 = vtanh.f32 %v572_v16  ;;  %v575_v17 = vpop.f32.mrb[12].mxu1 }
 0x3be   :  { %v576_v18 = vadd.f32 %v575_v17, %v478_v2  ;;  %v577_v19 = vpop.f32.mrb[13].mxu1 }
 0x3bf   :  { %v578_v20 = vadd.f32 %v577_v19, %v478_v2 }
 0x3c0   :  { %835 = vtanh.f32 %v576_v18 }
 0x3c1   :  { %v581_v22 = vpop.f32.mrb[14].mxu1  ;;  %837 = vtanh.f32 %v578_v20 }
 0x3c2   :  { %v582_v23 = vadd.f32 %v581_v22, %v483_v21  ;;  %v583_v24 = vpop.f32.mrb[15].mxu1  ;;  %v828_v26 = vpop.eup %827 }
 0x3c3   :  { %v584_v25 = vadd.f32 %v583_v24, %v483_v21  ;;  %v830_v27 = vpop.eup %829 }
 0x3c4   :  { %839 = vtanh.f32 %v582_v23 }
 0x3c5   :  { %841 = vtanh.f32 %v584_v25 }
 0x3c6   :  { %v832_v28 = vpop.eup %831 }
 0x3c7   :  { %v834_v29 = vpop.eup %833  ;;  %v768_v30 = vpack.c.bf16 %v832_v28, %v828_v26 }
 0x3c8   :  { %v766_v31 = vpack.c.bf16 %v834_v29, %v830_v27 }
 0x3ca   :  { %767 = vmatprep.subr.bf16.mxu0 %v766_v31  ;;  %v836_v32 = vpop.eup %835 }
 0x3cb   :  { %769 = vmatpush1.bf16.msra.mxu0 %v768_v30  ;;  %v838_v33 = vpop.eup %837 }
 0x3ce   :  { %v840_v34 = vpop.eup %839 }
 0x3cf   :  { %v842_v35 = vpop.eup %841  ;;  %v772_v36 = vpack.c.bf16 %v840_v34, %v836_v32 }
 0x3d0   :  { %v770_v37 = vpack.c.bf16 %v842_v35, %v838_v33 }
 0x3d2   :  { %771 = vmatprep.subr.bf16.mxu0 %v770_v37 }
 0x3d3   :  { %773 = vmatpush1.bf16.msra.mxu0 %v772_v36 }
 0x3d6   :  { %740 = vmatmul.mubr.msk.f32.vlgmr.msra.gmra.mrb[16].mxu0 %vm206_vm2, %v594_v38 }
 0x4a9   :  { %v670_v40 = vpop.f32.mrb[16].mxu0 }
 0x4aa   :  { %v671_v41 = vadd.f32 %v670_v40, %v599_v39  ;;  %v672_v42 = vpop.f32.mrb[17].mxu0 }
 0x4ab   :  { %v673_v43 = vadd.f32 %v672_v42, %v599_v39 }
 0x4ad   :  { %v677_v44 = vcombine.low %v671_v41, %v673_v43 }
 0x4af   :  { %741 = vst.sshfl [vmem:[#allocation2] sm:$0x33 pattern:$0x76325410] %v677_v44 }
 0x4b0   :  { %854 = shalt.err (!%p851_p4)
}
 0x4b1   :  { %s855_s5 = scalar_lea.hbm %s1062_s6, 64 }
 0x4b2   :  { %p856_p5 = scmp.ne.s32.totalorder %s1062_s6, %s855_s5  ;;  %p859_p6 = scmp.lt.u32.totalorder %s855_s5, %s1062_s6 }
 0x4b4   :  { %p861_p7 = pnand %p859_p6, %p856_p5 }
 0x4b6   :  { %864 = shalt.err (!%p861_p7)
}
 0x4b7   :  { %696 = dma.vmem_to_hbm [thread:$0]  %s694_s12, 64, %s1062_s6, [#allocation3]  }
 0x4b8   :  { %865 = dma.done.wait [#allocation3], 64  }
 0x4b9   :  { %866 = vsyncadd [#allocation3], 4294967232 }
 0x4ba   :  { %700 = vsyncpa [#allocation3], 1 }

</bundles_post_ra>
